<compile_context>
chip_gen: v7x
topology: tpu7x:2x2x1
jax: 0.10.0
libtpu: 0.0.40
codegen_flags: <defaults>
</compile_context>

<pallas_src>
import functools

import jax
import jax.numpy as jnp
from jax import lax
from jax.experimental import pallas as pl
from jax.experimental.pallas import tpu as pltpu

_LANES = 128
_ROW_F32_BYTES = _LANES * 4           # f32-equivalent bytes per lane-row
_TARGET_TILE_BYTES = 4 << 20          # ~4 MiB data tile per grid step
_VMEM_LIMIT_BYTES = 48 << 20          # in+out double buffers + slack (< v7x 64 MiB/TC)


def _whole_image_kernel(mean_ref, inv_ref, x_ref, o_ref, *, rows_per_chan, num_chan):
    """Block = (n_blk, C*rows, 128): several whole images per grid step.

    mean / 1/std are expanded from SMEM f32 scalars via a row-index select
    chain; the (1, C*rows, 128) broadcast tile is shared by every image in
    the block, so the VPU cost is amortized over n_blk images.
    """
    shape = (1, x_ref.shape[1], x_ref.shape[2])
    row = lax.broadcasted_iota(jnp.int32, shape, 1)      # image-local lane-row index
    zero = jnp.zeros(shape, jnp.float32)
    m = zero + mean_ref[0]
    s = zero + inv_ref[0]
    for c in range(1, num_chan):                          # C-1 compares + selects
        sel = row >= c * rows_per_chan
        m = jnp.where(sel, mean_ref[c], m)
        s = jnp.where(sel, inv_ref[c], s)
    x = x_ref[...].astype(jnp.float32)                    # compute in f32
    o_ref[...] = ((x - m) * s).astype(o_ref.dtype)        # cast only on store


def _per_channel_kernel(mean_ref, inv_ref, x_ref, o_ref):
    """Block = (n_blk, 1, r_blk, 128): a row-chunk of a single channel plane."""
    c = pl.program_id(1)
    m = mean_ref[c]                                       # f32 scalar from SMEM
    s = inv_ref[c]                                        # hoisted reciprocal
    x = x_ref[...].astype(jnp.float32)
    o_ref[...] = ((x - m) * s).astype(o_ref.dtype)


def normalization(img, mean, std):
    """(img - mean.view(-1,1,1)) / std.view(-1,1,1) for an NCHW image batch."""
    N, C, H, W = img.shape
    mean = jnp.asarray(mean, jnp.float32).reshape(C)
    inv_std = (1.0 / jnp.asarray(std, jnp.float32)).reshape(C)

    P = H * W
    rows = pl.cdiv(P, _LANES)             # lane-rows per channel plane
    pad = rows * _LANES - P

    x = img.reshape(N, C, P)
    if pad:
        # One extra pass, but keeps every load/store lane-dense (128 wide).
        x = jnp.pad(x, ((0, 0), (0, 0), (0, pad)))

    rows_budget = max(8, (_TARGET_TILE_BYTES // _ROW_F32_BYTES) // 8 * 8)
    img_rows = C * rows                   # lane-rows per whole image

    if img_rows <= rows_budget:
        # ---- small/medium images: whole-image blocks (one contiguous HBM
        # range per step, dense sublanes even for tiny planes). ----
        n_blk = min(N, max(1, rows_budget // img_rows))
        if n_blk >= N and N > 1:
            n_blk = pl.cdiv(N, 2)         # >= 2 grid steps so v7x megacore balances
        x3 = x.reshape(N, img_rows, _LANES)
        kernel = functools.partial(
            _whole_image_kernel, rows_per_chan=rows, num_chan=C)
        out = pl.pallas_call(
            kernel,
            out_shape=jax.ShapeDtypeStruct((N, img_rows, _LANES), img.dtype),
            grid=(pl.cdiv(N, n_blk),),
            in_specs=[
                pl.BlockSpec(memory_space=pltpu.SMEM),          # mean (C,) f32
                pl.BlockSpec(memory_space=pltpu.SMEM),          # 1/std (C,) f32
                pl.BlockSpec((n_blk, img_rows, _LANES), lambda n: (n, 0, 0)),
            ],
            out_specs=pl.BlockSpec((n_blk, img_rows, _LANES), lambda n: (n, 0, 0)),
            compiler_params=pltpu.CompilerParams(
                dimension_semantics=("parallel",),
                vmem_limit_bytes=_VMEM_LIMIT_BYTES),
        )(mean, inv_std, x3)
    else:
        # ---- large images: per-(image, channel) row-chunks; channel comes
        # from the grid, mean/1/std are SMEM scalars. ----
        r_blk = rows if rows <= rows_budget else rows_budget
        n_blk = min(N, max(1, rows_budget // min(rows, rows_budget)))
        x4 = x.reshape(N, C, rows, _LANES)
        out = pl.pallas_call(
            _per_channel_kernel,
            out_shape=jax.ShapeDtypeStruct((N, C, rows, _LANES), img.dtype),
            grid=(pl.cdiv(N, n_blk), C, pl.cdiv(rows, r_blk)),
            in_specs=[
                pl.BlockSpec(memory_space=pltpu.SMEM),          # mean (C,) f32
                pl.BlockSpec(memory_space=pltpu.SMEM),          # 1/std (C,) f32
                pl.BlockSpec((n_blk, 1, r_blk, _LANES),
                             lambda n, c, r: (n, c, r, 0)),
            ],
            out_specs=pl.BlockSpec((n_blk, 1, r_blk, _LANES),
                                   lambda n, c, r: (n, c, r, 0)),
            compiler_params=pltpu.CompilerParams(
                dimension_semantics=("parallel", "parallel", "parallel"),
                vmem_limit_bytes=_VMEM_LIMIT_BYTES),
        )(mean, inv_std, x4)

    out = out.reshape(N, C, rows * _LANES)
    if pad:
        out = out[:, :, :P]
    return out.reshape(N, C, H, W)


if __name__ == "__main__":
    # Deterministic parameters (ImageNet-style per-channel stats).
    mean = jnp.array([0.485, 0.456, 0.406], dtype=jnp.float32)
    std = jnp.array([0.229, 0.224, 0.225], dtype=jnp.float32)

    key = jax.random.PRNGKey(0)
    img = jax.random.uniform(key, (2, 3, 16, 16), dtype=jnp.float32)  # NCHW

    out = jax.block_until_ready(normalization(img, mean, std))

    # Reference (plain JAX broadcast, mirrors torch semantics with true divide).
    ref = (img - mean[None, :, None, None]) / std[None, :, None, None]
    assert out.shape == img.shape and out.dtype == img.dtype
    assert jnp.allclose(out, ref, atol=1e-5, rtol=1e-5)

    print("KERNEL_OK")
</pallas_src>

<mosaic_0001>
module attributes {stable_mosaic.version = 11 : i64} {
  func.func @_whole_image_kernel(%arg0: i32, %arg1: memref<3xf32, #tpu.memory_space<smem>>, %arg2: memref<3xf32, #tpu.memory_space<smem>>, %arg3: memref<1x6x128xf32, #tpu.memory_space<vmem>>, %arg4: memref<1x6x128xf32, #tpu.memory_space<vmem>>) attributes {dimension_semantics = [#tpu.dimension_semantics<parallel>], iteration_bounds = array<i64: 2>, scalar_prefetch = 0 : i64, scratch_operands = 0 : i64, tpu.core_type = #tpu.core_type<tc>, window_params = [{transform_indices = @transform_0, window_bounds = array<i64: 3>}, {transform_indices = @transform_1, window_bounds = array<i64: 3>}, {transform_indices = @transform_2, window_bounds = array<i64: 1, 6, 128>}, {transform_indices = @transform_3, window_bounds = array<i64: 1, 6, 128>}]} {
    %0 = tpu.iota {dimensions = array<i32: 1>} : vector<1x6x128xi32>
    %cst = arith.constant 0.000000e+00 : f32
    %1 = vector.broadcast %cst : f32 to vector<1x6x128xf32>
    %c0 = arith.constant 0 : index
    %2 = memref.load %arg1[%c0] : memref<3xf32, #tpu.memory_space<smem>>
    %3 = vector.broadcast %2 : f32 to vector<1x6x128xf32>
    %4 = arith.addf %1, %3 : vector<1x6x128xf32>
    %c0_0 = arith.constant 0 : index
    %5 = memref.load %arg2[%c0_0] : memref<3xf32, #tpu.memory_space<smem>>
    %6 = vector.broadcast %5 : f32 to vector<1x6x128xf32>
    %7 = arith.addf %1, %6 : vector<1x6x128xf32>
    %c2_i32 = arith.constant 2 : i32
    %8 = vector.broadcast %c2_i32 : i32 to vector<1x6x128xi32>
    %9 = arith.cmpi sge, %0, %8 : vector<1x6x128xi32>
    %c1 = arith.constant 1 : index
    %10 = memref.load %arg1[%c1] : memref<3xf32, #tpu.memory_space<smem>>
    %11 = vector.broadcast %10 : f32 to vector<1x6x128xf32>
    %12 = arith.select %9, %11, %4 : vector<1x6x128xi1>, vector<1x6x128xf32>
    %c1_1 = arith.constant 1 : index
    %13 = memref.load %arg2[%c1_1] : memref<3xf32, #tpu.memory_space<smem>>
    %14 = vector.broadcast %13 : f32 to vector<1x6x128xf32>
    %15 = arith.select %9, %14, %7 : vector<1x6x128xi1>, vector<1x6x128xf32>
    %c4_i32 = arith.constant 4 : i32
    %16 = vector.broadcast %c4_i32 : i32 to vector<1x6x128xi32>
    %17 = arith.cmpi sge, %0, %16 : vector<1x6x128xi32>
    %c2 = arith.constant 2 : index
    %18 = memref.load %arg1[%c2] : memref<3xf32, #tpu.memory_space<smem>>
    %19 = vector.broadcast %18 : f32 to vector<1x6x128xf32>
    %20 = arith.select %17, %19, %12 : vector<1x6x128xi1>, vector<1x6x128xf32>
    %c2_2 = arith.constant 2 : index
    %21 = memref.load %arg2[%c2_2] : memref<3xf32, #tpu.memory_space<smem>>
    %22 = vector.broadcast %21 : f32 to vector<1x6x128xf32>
    %23 = arith.select %17, %22, %15 : vector<1x6x128xi1>, vector<1x6x128xf32>
    %c0_3 = arith.constant 0 : index
    %c0_4 = arith.constant 0 : index
    %c0_5 = arith.constant 0 : index
    %24 = vector.load %arg3[%c0_3, %c0_4, %c0_5] : memref<1x6x128xf32, #tpu.memory_space<vmem>>, vector<1x6x128xf32>
    %25 = arith.subf %24, %20 : vector<1x6x128xf32>
    %26 = arith.mulf %25, %23 : vector<1x6x128xf32>
    %c0_6 = arith.constant 0 : index
    %c0_7 = arith.constant 0 : index
    %c0_8 = arith.constant 0 : index
    %27 = vector.load %arg4[%c0_6, %c0_7, %c0_8] : memref<1x6x128xf32, #tpu.memory_space<vmem>>, vector<1x6x128xf32>
    tpu.vector_store %arg4[%c0_6, %c0_7, %c0_8], %26 {strides = array<i32>} : memref<1x6x128xf32, #tpu.memory_space<vmem>>, vector<1x6x128xf32>,
    return
  }
  func.func @transform_0(%arg0: i32) -> i32 {
    %c0_i32 = arith.constant 0 : i32
    %c0_i32_0 = arith.constant 0 : i32
    return %c0_i32 : i32
  }
  func.func @transform_1(%arg0: i32) -> i32 {
    %c0_i32 = arith.constant 0 : i32
    %c0_i32_0 = arith.constant 0 : i32
    return %c0_i32 : i32
  }
  func.func @transform_2(%arg0: i32) -> (i32, i32, i32) {
    %c0_i32 = arith.constant 0 : i32
    %c0_i32_0 = arith.constant 0 : i32
    %c0_i32_1 = arith.constant 0 : i32
    return %arg0, %c0_i32, %c0_i32_0 : i32, i32, i32
  }
  func.func @transform_3(%arg0: i32) -> (i32, i32, i32) {
    %c0_i32 = arith.constant 0 : i32
    %c0_i32_0 = arith.constant 0 : i32
    %c0_i32_1 = arith.constant 0 : i32
    return %arg0, %c0_i32, %c0_i32_0 : i32, i32, i32
  }
}

</mosaic_0001>

<bundles_post_ra>
// kernel: tpu_custom_call.1
= control target key start
LH: loop header
LB: loop body
LE: loop exit
PB: predicated region body
PF: predicated region fallthrough
CT: control target
= control target key end

     0   :  { %8 = vsyncpa [#allocation3], 0  ;;  %s464_s0 = inlined_call_operand.vmem [shape: f32[3], index: 0, kind: input, shape index: {}]   ;;  %s465_s1 = inlined_call_operand.vmem [shape: f32[3], index: 1, kind: input, shape index: {}]   ;;  %s466_s2 = inlined_call_operand.vmem [shape: f32[2,6,128], index: 2, kind: input, shape index: {}]   ;;  %s467_s3 = inlined_call_operand.vmem [shape: f32[2,6,128], index: 3, kind: output, shape index: {}]  }
   0x1   :  { %9 = vsyncpa [#allocation5], 0  ;;  %s408_s12 = smov 0  }
   0x2 LB: > { %s414_s13 = sadd.s32 4294967295, %s384_s12   ;;  %p296_p0 = scmp.ge.s32.totalorder %s384_s12, 1  ;;  %s384_s12 = sphi %s408_s12, %s15_s12  }
   0x3   : > { %p114_p1 = scmp.lt.s32.totalorder %s384_s12, 3  ;;  %s127_s16 = sshll.u32 %s464_s0, 4  ;;  %s128_s16 = int_to_ptr.vmem [resolvable:$true] %s127_s16 }
   0x4   : > { %p468_p3 = scmp.eq.s32.totalorder %s414_s13, 0  ;;  %s138_s20 = sshll.u32 %s465_s1, 4  ;;  %s139_s20 = int_to_ptr.vmem [resolvable:$true] %s138_s20 }
   0x5   : > { %p421_p2 = pnand %p296_p0, %p114_p1  ;;  %s340_s22 = scalar_lea.vmem %s128_s16, 16 }
   0x6   : > { %p341_p6 = scmp.ne.s32.totalorder %s128_s16, %s340_s22  ;;  %p348_p10 = scmp.lt.s32.totalorder %s128_s16, %s128_s16 }
   0x7   : > { %s470_s17 = scalar_select %p421_p2, 1, 0 }
   0x8   : > { %p319_p4 = pneg %p421_p2  ;;  %p349_p11 = scmp.lt.s32.totalorder %s340_s22, %s340_s22 }
   0xa   : > { %p433_p5 = pnand %p468_p3, %p319_p4  ;;  %p350_p12 = por %p349_p11, %p348_p10 }
   0xc   : > { %p342_p7 = pneg %p433_p5 }
   0xe   : > { %p343_p8 = pnand %p342_p7, %p341_p6 }
  0x10   : > { %p344_p9 = pneg %p343_p8 }
  0x12   : > { %p351_p13 = pnand %p350_p12, %p344_p9 }
  0x14   : > { %354 = shalt.err (!%p351_p13)
}
  0x15   : > { %s386_s23 = smov [#allocation2]   ;;  %s355_s24 = scalar_lea.vmem %s139_s20, 16 }
  0x16   : > { %322 = dma.vmem_to_smem (!%p433_p5), %s128_s16, 16, %s386_s23, [#allocation3]  }
  0x17   : > { %p356_p0 = scmp.ne.s32.totalorder %s139_s20, %s355_s24  ;;  %p363_p3 = scmp.lt.s32.totalorder %s139_s20, %s139_s20 }
  0x18   : > { %p364_p2 = scmp.lt.s32.totalorder %s355_s24, %s355_s24 }
  0x19   : > { %p358_p1 = pnand %p356_p0, %p342_p7 }
  0x1a   : > { %p365_p6 = por %p364_p2, %p363_p3 }
  0x1b   : > { %p359_p4 = pneg %p358_p1 }
  0x1d   : > { %p366_p8 = pnand %p365_p6, %p359_p4 }
  0x1f   : > { %369 = shalt.err (!%p366_p8)
}
  0x20   : > { %s387_s25 = smov [#allocation4]   ;;  %p472_p9 = scmp.ne.s32.totalorder %s470_s17, 0 }
  0x21   : > { %325 = dma.vmem_to_smem (!%p433_p5), %s139_s20, 16, %s387_s25, [#allocation5]  }
  0x22   : > { %158 = sbr.rel (%p472_p9) target bundleno = 64 (0x40), region = 32  ;;  %p473_p10 = scmp.eq.s32.totalorder (!%p472_p9), %s414_s13, 0 }
  0x29   : > { %375 = dma.done.wait (%p473_p10), [#allocation3], 16   ;;  %p474_p11 = pmov %p473_p10 }
  0x2a   : > { %p475_p7 = pmov %p473_p10 }
  0x2b   : > { %377 = vsyncadd (%p474_p11), [#allocation3], 4294967280 }
  0x2c   : > { %379 = dma.done.wait (%p475_p7), [#allocation5], 16   ;;  %p476_p2 = pmov %p475_p7 }
  0x2e   : > { %381 = vsyncadd (%p476_p2), [#allocation5], 4294967280 }
  0x2f   : > { %168 = sfence }
  0x30   : > { %p185_p3 = scmp.lt.s32.totalorder %s414_s13, 1  ;;  %v193_v0 = vlaneseq  ;;  %s195_s26 = sld [smem:[#allocation2]] }
  0x31   : > { %s198_s27 = sld [smem:[#allocation4]]  ;;  %s305_s28 = sld [smem:[#allocation2 + $0x1]] }
  0x32   : > { %s478_s13 = smov (!%p185_p3, %s414_s13), 1  ;;  %v194_v1 = vshrl.u32 %v193_v0, 7  ;;  %s306_s29 = sld [smem:[#allocation4 + $0x1]] }
  0x33   : > { %s307_s30 = sld [smem:[#allocation2 + $0x2]]  ;;  %s303_s4 = sshll.u32 %s478_s13, 3 }
  0x34   : > { %s308_s5 = sld [smem:[#allocation4 + $0x2]]  ;;  %s188_s8 = scalar_lea.vmem %s466_s2, %s303_s4  ;;  %vm201_vm0 = vcmp.ge.s32.totalorder %v194_v1, 2  ;;  %vm208_vm1 = vcmp.ge.s32.totalorder %v194_v1, 4 }
  0x35   : > { %v215_v6 = vld [vmem:[%s188_s8] sm:$0x3f]  ;;  %s192_s11 = scalar_lea.vmem %s467_s3, %s303_s4 }
  0x36   : > { %v196_v2 = vstv %s195_s26 }
  0x37   : > { %v199_v3 = vstv %s198_s27  ;;  %v203_v4 = vstv %s305_s28 }
  0x38   : > { %v204_v5 = vsel %vm201_vm0, %v203_v4, %v196_v2  ;;  %v206_v7 = vstv %s306_s29 }
  0x39   : > { %v210_v8 = vstv %s307_s30  ;;  %v207_v9 = vsel %vm201_vm0, %v206_v7, %v199_v3 }
  0x3a   : > { %v211_v10 = vsel %vm208_vm1, %v210_v8, %v204_v5  ;;  %v213_v11 = vstv %s308_s5 }
  0x3b   : > { %v214_v12 = vsel %vm208_vm1, %v213_v11, %v207_v9  ;;  %v216_v13 = vsub.f32 %v215_v6, %v211_v10 }
  0x3d   : > { %v217_v14 = vmul.f32 %v216_v13, %v214_v12 }
  0x3f   : > { %218 = vst [vmem:[%s192_s11] sm:$0x3f] %v217_v14 }
  0x40 PF: > { %s15_s12 = sadd.s32 1, %s384_s12  }
  0x41   : > { %p12_p5 = scmp.ge.s32.totalorder %s15_s12, 4  }
  0x43   :  { %14 = sbr.rel (!%p12_p5) target bundleno = 2 (0x2), region = 71 }
  0x4a   :  { %238 = vsyncpa [#allocation3], 1 }
  0x4b   :  { %240 = vsyncpa [#allocation3 + $0x1], 1 }
  0x4c   :  { %241 = vsyncpa [#allocation5], 1 }

</bundles_post_ra>
